<compile_context>
chip_gen: v7x
topology: tpu7x:2x2x1
jax: 0.10.0
libtpu: 0.0.40
codegen_flags: <defaults>
</compile_context>

<pallas_src>
import jax
import jax.numpy as jnp
from jax.experimental import pallas as pl
from jax.experimental.pallas import tpu as pltpu


def conv1x1_kernel(w_ref, x_ref, o_ref):
    # w_ref: (block_cout, C_in) f32  -- weight tile (native PyTorch layout)
    # x_ref: (C_in, H*W)        f32  -- whole activation, resident across steps
    # o_ref: (block_cout, H*W)  f32
    w = w_ref[...].astype(jnp.bfloat16)  # VMEM-local casts -> bf16 MXU path
    x = x_ref[...].astype(jnp.bfloat16)
    o_ref[...] = jnp.dot(
        w, x, preferred_element_type=jnp.float32
    ).astype(o_ref.dtype)


@jax.jit
def conv2d_1x1(x_nchw: jax.Array, weight_oihw: jax.Array) -> jax.Array:
    """1x1 conv, stride 1, no bias.

    x_nchw:      (1, C_in, H, W)
    weight_oihw: (C_out, C_in, 1, 1)  (PyTorch Conv2d weight)
    returns:     (1, C_out, H, W)
    """
    n, c_in, h, w = x_nchw.shape
    assert n == 1, "kernel specialized for batch size 1 (as in the module)"
    c_out = weight_oihw.shape[0]
    hw = h * w

    # Free reshapes: no data movement, no dtype conversion in the wrapper.
    x_mat = x_nchw.reshape(c_in, hw)
    w_mat = weight_oihw.reshape(c_out, c_in)

    # 4 sublane-aligned blocks over C_out: enough to pipeline the weight DMA
    # and output writeback behind MXU work (and feed both TCs on v7x) without
    # excessive per-step overhead.
    block_co = min(c_out, 336)
    grid = (pl.cdiv(c_out, block_co),)

    out_mat = pl.pallas_call(
        conv1x1_kernel,
        out_shape=jax.ShapeDtypeStruct((c_out, hw), x_nchw.dtype),
        grid=grid,
        in_specs=[
            pl.BlockSpec((block_co, c_in), lambda i: (i, 0)),  # weight tile
            pl.BlockSpec((c_in, hw), lambda i: (0, 0)),        # whole activation
        ],
        out_specs=pl.BlockSpec((block_co, hw), lambda i: (i, 0)),
        compiler_params=pltpu.CompilerParams(
            dimension_semantics=("parallel",),
        ),
    )(w_mat, x_mat)

    # Free reshape back to NCHW.
    return out_mat.reshape(n, c_out, h, w)


if __name__ == "__main__":
    key = jax.random.PRNGKey(0)
    k_x, k_w = jax.random.split(key)

    # Shapes implied by the module's forward pass.
    N, C_IN, H, W = 1, 224, 14, 14
    C_OUT = 1344

    x = jax.random.normal(k_x, (N, C_IN, H, W), dtype=jnp.float32)
    # Deterministic weight init (Conv2d(224, 1344, kernel_size=1, bias=False)):
    # kaiming-uniform-like bound = 1/sqrt(fan_in), fan_in = C_IN * 1 * 1.
    bound = 1.0 / jnp.sqrt(jnp.float32(C_IN))
    weight = jax.random.uniform(
        k_w, (C_OUT, C_IN, 1, 1), dtype=jnp.float32, minval=-bound, maxval=bound
    )

    out = conv2d_1x1(x, weight)
    out = jax.block_until_ready(out)

    # Correctness check against plain-JAX f32 reference (1x1 conv == channel
    # matmul). Tolerance loosened because the kernel computes in bf16 with f32
    # accumulation.
    ref = jnp.einsum("nchw,oc->nohw", x, weight.reshape(C_OUT, C_IN))
    assert out.shape == (N, C_OUT, H, W)
    assert jnp.allclose(out, ref, atol=5e-2, rtol=5e-2)

    print("KERNEL_OK")
</pallas_src>

<mosaic_0001>
module attributes {stable_mosaic.version = 11 : i64} {
  func.func @conv1x1_kernel(%arg0: i32, %arg1: memref<336x224xf32, #tpu.memory_space<vmem>>, %arg2: memref<224x196xf32, #tpu.memory_space<vmem>>, %arg3: memref<336x196xf32, #tpu.memory_space<vmem>>) attributes {dimension_semantics = [#tpu.dimension_semantics<parallel>], iteration_bounds = array<i64: 4>, scalar_prefetch = 0 : i64, scratch_operands = 0 : i64, tpu.core_type = #tpu.core_type<tc>, window_params = [{transform_indices = @transform_0, window_bounds = array<i64: 336, 224>}, {pipeline_mode = #tpu.pipeline_mode<synchronous>, transform_indices = @transform_1, window_bounds = array<i64: 224, 196>}, {transform_indices = @transform_2, window_bounds = array<i64: 336, 196>}]} {
    %c0 = arith.constant 0 : index
    %c0_0 = arith.constant 0 : index
    %0 = vector.load %arg1[%c0, %c0_0] : memref<336x224xf32, #tpu.memory_space<vmem>>, vector<336x224xf32>
    %1 = arith.truncf %0 : vector<336x224xf32> to vector<336x224xbf16>
    %c0_1 = arith.constant 0 : index
    %c0_2 = arith.constant 0 : index
    %2 = vector.load %arg2[%c0_1, %c0_2] : memref<224x196xf32, #tpu.memory_space<vmem>>, vector<224x196xf32>
    %3 = arith.truncf %2 : vector<224x196xf32> to vector<224x196xbf16>
    %cst = arith.constant dense<0.000000e+00> : vector<336x196xf32>
    %4 = tpu.matmul %1, %3, %cst {dimension_numbers = #tpu.dot_dimension_numbers<[1], [0], [0], [1], [0, 0, 1, 1], [], []>} : vector<336x224xbf16>, vector<224x196xbf16>, vector<336x196xf32> -> vector<336x196xf32>
    %c0_3 = arith.constant 0 : index
    %c0_4 = arith.constant 0 : index
    %5 = vector.load %arg3[%c0_3, %c0_4] : memref<336x196xf32, #tpu.memory_space<vmem>>, vector<336x196xf32>
    tpu.vector_store %arg3[%c0_3, %c0_4], %4 {strides = array<i32>} : memref<336x196xf32, #tpu.memory_space<vmem>>, vector<336x196xf32>,
    return
  }
  func.func @transform_0(%arg0: i32) -> (i32, i32) {
    %c0_i32 = arith.constant 0 : i32
    %c0_i32_0 = arith.constant 0 : i32
    return %arg0, %c0_i32 : i32, i32
  }
  func.func @transform_1(%arg0: i32) -> (i32, i32) {
    %c0_i32 = arith.constant 0 : i32
    %c0_i32_0 = arith.constant 0 : i32
    %c0_i32_1 = arith.constant 0 : i32
    return %c0_i32, %c0_i32_0 : i32, i32
  }
  func.func @transform_2(%arg0: i32) -> (i32, i32) {
    %c0_i32 = arith.constant 0 : i32
    %c0_i32_0 = arith.constant 0 : i32
    return %arg0, %c0_i32 : i32, i32
  }
}

</mosaic_0001>

<bundles_post_ra>
// kernel: conv2d_1x1.1
= control target key start
LH: loop header
LB: loop body
LE: loop exit
PB: predicated region body
PF: predicated region fallthrough
CT: control target
= control target key end

     0   :  { %s906_s9 = smov 0   ;;  %s1333_s0 = inlined_call_operand.vmem [shape: f32[1344,224], index: 0, kind: input, shape index: {}]   ;;  %s1334_s1 = inlined_call_operand.vmem [shape: f32[224,196], index: 1, kind: input, shape index: {}]   ;;  %s1335_s2 = inlined_call_operand.vmem [shape: f32[1344,196], index: 2, kind: output, shape index: {}]  }
   0x1 LB: > { %s813_s10 = sadd.s32 4294967295, %s889_s9   ;;  %p817_p0 = scmp.ge.s32.totalorder %s889_s9, 1  ;;  %s889_s9 = sphi %s906_s9, %s12_s9  }
   0x2   : > { %p114_p1 = scmp.lt.s32.totalorder %s889_s9, 5 }
   0x4   : > { %p115_p2 = pnand %p817_p0, %p114_p1 }
   0x5   : > { %v280_v0 = vld [vmem:[%s1334_s1 + $0x8] sm:$0xff] (!%p115_p2)  ;;  %v282_v1 = vld [vmem:[%s1334_s1 + $0x18] sm:$0xff] (!%p115_p2)  ;;  %v279_v2 = vld [vmem:[%s1334_s1] sm:$0xff] (!%p115_p2)  ;;  %s138_s17 = smul.u32 (!%p115_p2), 42, %s813_s10  ;;  %vm363_vm0 = vcmask (!%p115_p2), 785408   ;;  %vm671_vm1 = vcmask (!%p115_p2), 556032  }
   0x6   : > { %118 = sbr.rel (%p115_p2) target bundleno = 360 (0x168), region = 28  ;;  %v336_v3 = vpack.c.bf16 (!%p115_p2), %v282_v1, %v280_v0  ;;  %v281_v4 = vld [vmem:[%s1334_s1 + $0x10] sm:$0xff] (!%p115_p2)  ;;  %v284_v5 = vld [vmem:[%s1334_s1 + $0x28] sm:$0xff] (!%p115_p2)  ;;  %v286_v6 = vld [vmem:[%s1334_s1 + $0x38] sm:$0xff] (!%p115_p2) }
   0x7   : > { %v335_v7 = vpack.c.bf16 (!%p115_p2), %v281_v4, %v279_v2  ;;  %v338_v8 = vpack.c.bf16 (!%p115_p2), %v286_v6, %v284_v5  ;;  %v283_v9 = vld [vmem:[%s1334_s1 + $0x20] sm:$0xff] (!%p115_p2)  ;;  %v285_v10 = vld [vmem:[%s1334_s1 + $0x30] sm:$0xff] (!%p115_p2)  ;;  %v288_v11 = vld [vmem:[%s1334_s1 + $0x48] sm:$0xff] (!%p115_p2)  ;;  %p139_p3 = scmp.lt.s32.totalorder (!%p115_p2), %s138_s17, 167 }
   0x8   : > { %427 = vmatprep.subr.bf16.mxu0 (!%p115_p2), %v336_v3  ;;  %847 = vmatprep.subr.bf16.mxu1 (!%p115_p2), %v336_v3  ;;  %v290_v12 = vld [vmem:[%s1334_s1 + $0x58] sm:$0xff] (!%p115_p2)  ;;  %v337_v13 = vpack.c.bf16 (!%p115_p2), %v285_v10, %v283_v9  ;;  %v287_v15 = vld [vmem:[%s1334_s1 + $0x40] sm:$0xff] (!%p115_p2)  ;;  %v289_v16 = vld [vmem:[%s1334_s1 + $0x50] sm:$0xff] (!%p115_p2) }
   0x9   : > { %428 = vmatpush1.bf16.msra.mxu0 (!%p115_p2), %v335_v7  ;;  %861 = vmatpush1.bf16.msra.mxu1 (!%p115_p2), %v335_v7  ;;  %v340_v14 = vpack.c.bf16 (!%p115_p2), %v290_v12, %v288_v11  ;;  %v292_v17 = vld [vmem:[%s1334_s1 + $0x68] sm:$0xff] (!%p115_p2)  ;;  %v294_v18 = vld [vmem:[%s1334_s1 + $0x78] sm:$0xff] (!%p115_p2)  ;;  %v339_v19 = vpack.c.bf16 (!%p115_p2), %v289_v16, %v287_v15  ;;  %v291_v21 = vld [vmem:[%s1334_s1 + $0x60] sm:$0xff] (!%p115_p2) }
   0xa   : > { %429 = vmatprep.subr.bf16.mxu0 (!%p115_p2), %v338_v8  ;;  %848 = vmatprep.subr.bf16.mxu1 (!%p115_p2), %v338_v8  ;;  %v342_v20 = vpack.c.bf16 (!%p115_p2), %v294_v18, %v292_v17  ;;  %v293_v22 = vld [vmem:[%s1334_s1 + $0x70] sm:$0xff] (!%p115_p2)  ;;  %v296_v23 = vld [vmem:[%s1334_s1 + $0x88] sm:$0xff] (!%p115_p2)  ;;  %v298_v24 = vld [vmem:[%s1334_s1 + $0x98] sm:$0xff] (!%p115_p2) }
   0xb   : > { %v341_v25 = vpack.c.bf16 (!%p115_p2), %v293_v22, %v291_v21  ;;  %v344_v26 = vpack.c.bf16 (!%p115_p2), %v298_v24, %v296_v23  ;;  %v295_v27 = vld [vmem:[%s1334_s1 + $0x80] sm:$0xff] (!%p115_p2)  ;;  %v297_v28 = vld [vmem:[%s1334_s1 + $0x90] sm:$0xff] (!%p115_p2)  ;;  %v300_v29 = vld [vmem:[%s1334_s1 + $0xa8] sm:$0xff] (!%p115_p2) }
   0xc   : > { %v302_v30 = vld [vmem:[%s1334_s1 + $0xb8] sm:$0xff] (!%p115_p2)  ;;  %v343_v31 = vpack.c.bf16 (!%p115_p2), %v297_v28, %v295_v27  ;;  %v299_v33 = vld [vmem:[%s1334_s1 + $0xa0] sm:$0xff] (!%p115_p2)  ;;  %v301_v34 = vld [vmem:[%s1334_s1 + $0xb0] sm:$0xff] (!%p115_p2) }
   0xd   : > { %430 = vmatpush1.bf16.msra.mxu0 %v337_v13  ;;  %862 = vmatpush1.bf16.msra.mxu1 %v337_v13  ;;  %s1337_s17 = smov (!%p139_p3, %s138_s17), 167  ;;  %v346_v32 = vpack.c.bf16 %v302_v30, %v300_v29  ;;  %v304_v35 = vld [vmem:[%s1334_s1 + $0xc8] sm:$0xff]  ;;  %v306_v36 = vld [vmem:[%s1334_s1 + $0xd8] sm:$0xff]  ;;  %v345_v39 = vpack.c.bf16 %v301_v34, %v299_v33  ;;  %v303_v44 = vld [vmem:[%s1334_s1 + $0xc0] sm:$0xff] }
   0xe   : > { %431 = vmatprep.subr.bf16.mxu0 %v340_v14  ;;  %849 = vmatprep.subr.bf16.mxu1 %v340_v14  ;;  %s845_s22 = sshll.u32 %s1337_s17, 4  ;;  %v348_v43 = vpack.c.bf16 %v306_v36, %v304_v35  ;;  %v305_v45 = vld [vmem:[%s1334_s1 + $0xd0] sm:$0xff]  ;;  %v308_v47 = vld [vmem:[%s1334_s1 + $0xe8] sm:$0xff]  ;;  %v310_v48 = vld [vmem:[%s1334_s1 + $0xf8] sm:$0xff] }
   0xf   : > { %s988_s5 = scalar_lea.vmem %s1333_s0, %s845_s22  ;;  %v347_v49 = vpack.c.bf16 %v305_v45, %v303_v44  ;;  %v350_v50 = vpack.c.bf16 %v310_v48, %v308_v47  ;;  %v307_v51 = vld [vmem:[%s1334_s1 + $0xe0] sm:$0xff]  ;;  %v309_v52 = vld [vmem:[%s1334_s1 + $0xf0] sm:$0xff]  ;;  %v312_v53 = vld [vmem:[%s1334_s1 + $0x108] sm:$0xff]  ;;  %s1202_s3 = scalar_lea.vmem %s1335_s2, %s845_s22 }
  0x10   : > { %v154_v37 = vld [vmem:[%s988_s5 + $0x8] sm:$0xff]  ;;  %v156_v38 = vld [vmem:[%s988_s5 + $0x18] sm:$0xff]  ;;  %v349_v55 = vpack.c.bf16 %v309_v52, %v307_v51  ;;  %v311_v57 = vld [vmem:[%s1334_s1 + $0x100] sm:$0xff] }
  0x11   : > { %432 = vmatpush1.bf16.msra.mxu0 %v339_v19  ;;  %863 = vmatpush1.bf16.msra.mxu1 %v339_v19  ;;  %v238_v40 = vpack.c.bf16 %v156_v38, %v154_v37  ;;  %v198_v41 = vld [vmem:[%s988_s5 + $0x168] sm:$0xff]  ;;  %v200_v42 = vld [vmem:[%s988_s5 + $0x178] sm:$0xff]  ;;  %v313_v58 = vld [vmem:[%s1334_s1 + $0x110] sm:$0xff] }
  0x12   : > { %433 = vmatprep.subr.bf16.mxu0 %v342_v20  ;;  %850 = vmatprep.subr.bf16.mxu1 %v342_v20  ;;  %v260_v46 = vpack.c.bf16 %v200_v42, %v198_v41  ;;  %v314_v54 = vld [vmem:[%s1334_s1 + $0x118] sm:$0xff]  ;;  %v316_v59 = vld [vmem:[%s1334_s1 + $0x128] sm:$0xff]  ;;  %v351_v61 = vpack.c.bf16 %v313_v58, %v311_v57  ;;  %v315_v63 = vld [vmem:[%s1334_s1 + $0x120] sm:$0xff] }
  0x13   : > { %822 = vmatprep.mubr.msk.bf16.mxu0 %vm363_vm0, %v238_v40  ;;  %v352_v56 = vpack.c.bf16 %v314_v54, %v312_v53  ;;  %v318_v60 = vld [vmem:[%s1334_s1 + $0x138] sm:$0xff]  ;;  %v317_v0 = vld [vmem:[%s1334_s1 + $0x130] sm:$0xff]  ;;  %v320_v1 = vld [vmem:[%s1334_s1 + $0x148] sm:$0xff] }
  0x14   : > { %833 = vmatprep.mubr.msk.bf16.mxu1 %vm363_vm0, %v260_v46  ;;  %v354_v62 = vpack.c.bf16 %v318_v60, %v316_v59  ;;  %v322_v2 = vld [vmem:[%s1334_s1 + $0x158] sm:$0xff]  ;;  %v353_v3 = vpack.c.bf16 %v317_v0, %v315_v63  ;;  %v319_v5 = vld [vmem:[%s1334_s1 + $0x140] sm:$0xff]  ;;  %v321_v6 = vld [vmem:[%s1334_s1 + $0x150] sm:$0xff] }
  0x15   : > { %434 = vmatpush1.bf16.msra.mxu0 %v341_v25  ;;  %864 = vmatpush1.bf16.msra.mxu1 %v341_v25  ;;  %v356_v4 = vpack.c.bf16 %v322_v2, %v320_v1  ;;  %v324_v7 = vld [vmem:[%s1334_s1 + $0x168] sm:$0xff]  ;;  %v326_v8 = vld [vmem:[%s1334_s1 + $0x178] sm:$0xff]  ;;  %v355_v9 = vpack.c.bf16 %v321_v6, %v319_v5  ;;  %v323_v11 = vld [vmem:[%s1334_s1 + $0x160] sm:$0xff] }
  0x16   : > { %435 = vmatprep.subr.bf16.mxu0 %v344_v26  ;;  %851 = vmatprep.subr.bf16.mxu1 %v344_v26  ;;  %v358_v10 = vpack.c.bf16 %v326_v8, %v324_v7  ;;  %v325_v12 = vld [vmem:[%s1334_s1 + $0x170] sm:$0xff]  ;;  %v328_v13 = vld [vmem:[%s1334_s1 + $0x188] sm:$0xff]  ;;  %v330_v14 = vld [vmem:[%s1334_s1 + $0x198] sm:$0xff] }
  0x17   : > { %v357_v15 = vpack.c.bf16 %v325_v12, %v323_v11  ;;  %v360_v16 = vpack.c.bf16 %v330_v14, %v328_v13  ;;  %v327_v17 = vld [vmem:[%s1334_s1 + $0x180] sm:$0xff]  ;;  %v329_v18 = vld [vmem:[%s1334_s1 + $0x190] sm:$0xff]  ;;  %v332_v19 = vld [vmem:[%s1334_s1 + $0x1a8] sm:$0xff] }
  0x18   : > { %v334_v20 = vld [vmem:[%s1334_s1 + $0x1b8] sm:$0xff]  ;;  %v359_v21 = vpack.c.bf16 %v329_v18, %v327_v17  ;;  %v331_v23 = vld [vmem:[%s1334_s1 + $0x1a0] sm:$0xff]  ;;  %v333_v24 = vld [vmem:[%s1334_s1 + $0x1b0] sm:$0xff] }
  0x19   : > { %436 = vmatpush1.bf16.msra.mxu0 %v343_v31  ;;  %865 = vmatpush1.bf16.msra.mxu1 %v343_v31  ;;  %v362_v22 = vpack.c.bf16 %v334_v20, %v332_v19  ;;  %v153_v25 = vld [vmem:[%s988_s5] sm:$0xff]  ;;  %v155_v26 = vld [vmem:[%s988_s5 + $0x10] sm:$0xff]  ;;  %v361_v27 = vpack.c.bf16 %v333_v24, %v331_v23  ;;  %v158_v30 = vld [vmem:[%s988_s5 + $0x28] sm:$0xff] }
  0x1a   : > { %437 = vmatprep.subr.bf16.mxu0 %v346_v32  ;;  %852 = vmatprep.subr.bf16.mxu1 %v346_v32  ;;  %v197_v28 = vld [vmem:[%s988_s5 + $0x160] sm:$0xff]  ;;  %v199_v29 = vld [vmem:[%s988_s5 + $0x170] sm:$0xff]  ;;  %v160_v31 = vld [vmem:[%s988_s5 + $0x38] sm:$0xff]  ;;  %v237_v34 = vpack.c.bf16 %v155_v26, %v153_v25 }
  0x1b   : > { %v202_v32 = vld [vmem:[%s988_s5 + $0x188] sm:$0xff]  ;;  %v204_v33 = vld [vmem:[%s988_s5 + $0x198] sm:$0xff]  ;;  %v259_v35 = vpack.c.bf16 %v199_v29, %v197_v28  ;;  %v240_v36 = vpack.c.bf16 %v160_v31, %v158_v30  ;;  %v157_v38 = vld [vmem:[%s988_s5 + $0x20] sm:$0xff] }
  0x1c   : > { %v262_v37 = vpack.c.bf16 %v204_v33, %v202_v32  ;;  %v201_v40 = vld [vmem:[%s988_s5 + $0x180] sm:$0xff]  ;;  %v203_v41 = vld [vmem:[%s988_s5 + $0x190] sm:$0xff]  ;;  %v162_v42 = vld [vmem:[%s988_s5 + $0x48] sm:$0xff] }
  0x1d   : > { %438 = vmatpush1.bf16.msra.mxu0 %v345_v39  ;;  %866 = vmatpush1.bf16.msra.mxu1 %v345_v39  ;;  %v159_v39 = vld [vmem:[%s988_s5 + $0x30] sm:$0xff]  ;;  %v206_v44 = vld [vmem:[%s988_s5 + $0x1a8] sm:$0xff]  ;;  %v208_v45 = vld [vmem:[%s988_s5 + $0x1b8] sm:$0xff]  ;;  %v261_v47 = vpack.c.bf16 %v203_v41, %v201_v40 }
  0x1e   : > { %439 = vmatprep.subr.bf16.mxu0 %v348_v43  ;;  %853 = vmatprep.subr.bf16.mxu1 %v348_v43  ;;  %v164_v43 = vld [vmem:[%s988_s5 + $0x58] sm:$0xff]  ;;  %v239_v46 = vpack.c.bf16 %v159_v39, %v157_v38  ;;  %v163_v51 = vld [vmem:[%s988_s5 + $0x50] sm:$0xff]  ;;  %v205_v52 = vld [vmem:[%s988_s5 + $0x1a0] sm:$0xff] }
  0x1f   : > { %v242_v48 = vpack.c.bf16 %v164_v43, %v162_v42  ;;  %v207_v53 = vld [vmem:[%s988_s5 + $0x1b0] sm:$0xff]  ;;  %v166_v54 = vld [vmem:[%s988_s5 + $0x68] sm:$0xff]  ;;  %v212_v57 = vld [vmem:[%s988_s5 + $0x1d8] sm:$0xff] }
  0x20   : > { %v263_v59 = vpack.c.bf16 %v207_v53, %v205_v52  ;;  %v167_v63 = vld [vmem:[%s988_s5 + $0x70] sm:$0xff]  ;;  %v209_v0 = vld [vmem:[%s988_s5 + $0x1c0] sm:$0xff]  ;;  %v170_v2 = vld [vmem:[%s988_s5 + $0x88] sm:$0xff] }
  0x21   : > { %440 = vmatpush1.bf16.msra.mxu0 %v347_v49  ;;  %867 = vmatpush1.bf16.msra.mxu1 %v347_v49  ;;  %v264_v49 = vpack.c.bf16 %v208_v45, %v206_v44  ;;  %v211_v1 = vld [vmem:[%s988_s5 + $0x1d0] sm:$0xff]  ;;  %v216_v5 = vld [vmem:[%s988_s5 + $0x1f8] sm:$0xff]  ;;  %v213_v12 = vld [vmem:[%s988_s5 + $0x1e0] sm:$0xff] }
  0x22   : > { %441 = vmatprep.subr.bf16.mxu0 %v350_v50  ;;  %854 = vmatprep.subr.bf16.mxu1 %v350_v50  ;;  %v161_v50 = vld [vmem:[%s988_s5 + $0x40] sm:$0xff]  ;;  %v265_v7 = vpack.c.bf16 %v211_v1, %v209_v0  ;;  %v171_v11 = vld [vmem:[%s988_s5 + $0x90] sm:$0xff]  ;;  %v174_v14 = vld [vmem:[%s988_s5 + $0xa8] sm:$0xff] }
  0x23   : > { %v241_v58 = vpack.c.bf16 %v163_v51, %v161_v50  ;;  %v215_v13 = vld [vmem:[%s988_s5 + $0x1f0] sm:$0xff]  ;;  %v220_v17 = vld [vmem:[%s988_s5 + $0x218] sm:$0xff]  ;;  %v217_v24 = vld [vmem:[%s988_s5 + $0x200] sm:$0xff] }
  0x24   : > { %v267_v19 = vpack.c.bf16 %v215_v13, %v213_v12  ;;  %v175_v23 = vld [vmem:[%s988_s5 + $0xb0] sm:$0xff]  ;;  %v178_v26 = vld [vmem:[%s988_s5 + $0xc8] sm:$0xff]  ;;  %v224_v29 = vld [vmem:[%s988_s5 + $0x238] sm:$0xff] }
  0x25   : > { %442 = vmatpush1.bf16.msra.mxu0 %v349_v55  ;;  %868 = vmatpush1.bf16.msra.mxu1 %v349_v55  ;;  %v168_v55 = vld [vmem:[%s988_s5 + $0x78] sm:$0xff]  ;;  %v219_v25 = vld [vmem:[%s988_s5 + $0x210] sm:$0xff]  ;;  %v222_v28 = vld [vmem:[%s988_s5 + $0x228] sm:$0xff] }
  0x26   : > { %443 = vmatprep.subr.bf16.mxu0 %v352_v56  ;;  %855 = vmatprep.subr.bf16.mxu1 %v352_v56  ;;  %v210_v56 = vld [vmem:[%s988_s5 + $0x1c8] sm:$0xff]  ;;  %v244_v60 = vpack.c.bf16 %v168_v55, %v166_v54  ;;  %v269_v31 = vpack.c.bf16 %v219_v25, %v217_v24  ;;  %v272_v33 = vpack.c.bf16 %v224_v29, %v222_v28  ;;  %v184_v39 = vld [vmem:[%s988_s5 + $0xf8] sm:$0xff] }
  0x27   : > { %v182_v38 = vld [vmem:[%s988_s5 + $0xe8] sm:$0xff]  ;;  %v228_v41 = vld [vmem:[%s988_s5 + $0x258] sm:$0xff] }
  0x28   : > { %v226_v40 = vld [vmem:[%s988_s5 + $0x248] sm:$0xff]  ;;  %v252_v44 = vpack.c.bf16 %v184_v39, %v182_v38  ;;  %v188_v51 = vld [vmem:[%s988_s5 + $0x118] sm:$0xff] }
  0x29   : > { %444 = vmatpush1.bf16.msra.mxu0 %v351_v61  ;;  %869 = vmatpush1.bf16.msra.mxu1 %v351_v61  ;;  %v266_v61 = vpack.c.bf16 %v212_v57, %v210_v56  ;;  %v274_v45 = vpack.c.bf16 %v228_v41, %v226_v40  ;;  %v186_v50 = vld [vmem:[%s988_s5 + $0x108] sm:$0xff]  ;;  %v232_v53 = vld [vmem:[%s988_s5 + $0x278] sm:$0xff] }
  0x2a   : > { %445 = vmatprep.subr.bf16.mxu0 %v354_v62  ;;  %856 = vmatprep.subr.bf16.mxu1 %v354_v62  ;;  %v165_v62 = vld [vmem:[%s988_s5 + $0x60] sm:$0xff]  ;;  %v230_v52 = vld [vmem:[%s988_s5 + $0x268] sm:$0xff]  ;;  %v254_v56 = vpack.c.bf16 %v188_v51, %v186_v50  ;;  %v236_v1 = vld [vmem:[%s988_s5 + $0x298] sm:$0xff] }
  0x2b   : > { %v243_v6 = vpack.c.bf16 %v167_v63, %v165_v62  ;;  %v276_v57 = vpack.c.bf16 %v232_v53, %v230_v52  ;;  %v190_v62 = vld [vmem:[%s988_s5 + $0x128] sm:$0xff]  ;;  %v192_v63 = vld [vmem:[%s988_s5 + $0x138] sm:$0xff] }
  0x2c   : > { %v234_v0 = vld [vmem:[%s988_s5 + $0x288] sm:$0xff] }
  0x2d   : > { %446 = vmatpush1.bf16.msra.mxu0 %v353_v3  ;;  %870 = vmatpush1.bf16.msra.mxu1 %v353_v3  ;;  %v172_v3 = vld [vmem:[%s988_s5 + $0x98] sm:$0xff] }
  0x2e   : > { %447 = vmatprep.subr.bf16.mxu0 %v356_v4  ;;  %857 = vmatprep.subr.bf16.mxu1 %v356_v4  ;;  %v214_v4 = vld [vmem:[%s988_s5 + $0x1e8] sm:$0xff]  ;;  %v246_v8 = vpack.c.bf16 %v172_v3, %v170_v2 }
  0x31   : > { %448 = vmatpush1.bf16.msra.mxu0 %v355_v9  ;;  %871 = vmatpush1.bf16.msra.mxu1 %v355_v9  ;;  %v268_v9 = vpack.c.bf16 %v216_v5, %v214_v4  ;;  %v256_v4 = vpack.c.bf16 %v192_v63, %v190_v62  ;;  %v278_v5 = vpack.c.bf16 %v236_v1, %v234_v0 }
  0x32   : > { %449 = vmatprep.subr.bf16.mxu0 %v358_v10  ;;  %858 = vmatprep.subr.bf16.mxu1 %v358_v10  ;;  %v169_v10 = vld [vmem:[%s988_s5 + $0x80] sm:$0xff] }
  0x33   : > { %v245_v18 = vpack.c.bf16 %v171_v11, %v169_v10  ;;  %v194_v10 = vld [vmem:[%s988_s5 + $0x148] sm:$0xff]  ;;  %v196_v11 = vld [vmem:[%s988_s5 + $0x158] sm:$0xff] }
  0x35   : > { %450 = vmatpush1.bf16.msra.mxu0 %v357_v15  ;;  %872 = vmatpush1.bf16.msra.mxu1 %v357_v15  ;;  %v176_v15 = vld [vmem:[%s988_s5 + $0xb8] sm:$0xff] }
  0x36   : > { %451 = vmatprep.subr.bf16.mxu0 %v360_v16  ;;  %859 = vmatprep.subr.bf16.mxu1 %v360_v16  ;;  %v218_v16 = vld [vmem:[%s988_s5 + $0x208] sm:$0xff]  ;;  %v248_v20 = vpack.c.bf16 %v176_v15, %v174_v14  ;;  %v258_v14 = vpack.c.bf16 %v196_v11, %v194_v10  ;;  %v193_v15 = vld [vmem:[%s988_s5 + $0x140] sm:$0xff] }
  0x39   : > { %452 = vmatpush1.bf16.msra.mxu0 %v359_v21  ;;  %873 = vmatpush1.bf16.msra.mxu1 %v359_v21  ;;  %v270_v21 = vpack.c.bf16 %v220_v17, %v218_v16  ;;  %v195_v16 = vld [vmem:[%s988_s5 + $0x150] sm:$0xff] }
  0x3a   : > { %453 = vmatprep.subr.bf16.mxu0 %v362_v22  ;;  %860 = vmatprep.subr.bf16.mxu1 %v362_v22  ;;  %v173_v22 = vld [vmem:[%s988_s5 + $0xa0] sm:$0xff]  ;;  %v257_v17 = vpack.c.bf16 %v195_v16, %v193_v15 }
  0x3b   : > { %v247_v30 = vpack.c.bf16 %v175_v23, %v173_v22 }
  0x3d   : > { %454 = vmatpush1.bf16.msra.mxu0 %v361_v27  ;;  %874 = vmatpush1.bf16.msra.mxu1 %v361_v27  ;;  %v180_v27 = vld [vmem:[%s988_s5 + $0xd8] sm:$0xff] }
  0x3e   : > { %v250_v32 = vpack.c.bf16 %v180_v27, %v178_v26 }
  0x40   : > { %460 = vmatmul.mubr.bf16.vlgmr.msra.gmra.mrb[0].mxu0 %v237_v34  ;;  %570 = vmatmul.mubr.bf16.vlgmr.msra.gmra.mrb[0].mxu1 %v259_v35  ;;  %v177_v34 = vld [vmem:[%s988_s5 + $0xc0] sm:$0xff]  ;;  %v179_v35 = vld [vmem:[%s988_s5 + $0xd0] sm:$0xff] }
  0x41   : > { %823 = vmatprep.mubr.msk.bf16.mxu0 %vm363_vm0, %v240_v36  ;;  %834 = vmatprep.mubr.msk.bf16.mxu1 %vm363_vm0, %v262_v37  ;;  %v221_v36 = vld [vmem:[%s988_s5 + $0x220] sm:$0xff]  ;;  %v223_v37 = vld [vmem:[%s988_s5 + $0x230] sm:$0xff]  ;;  %v249_v42 = vpack.c.bf16 %v179_v35, %v177_v34 }
  0x42   : > { %v271_v43 = vpack.c.bf16 %v223_v37, %v221_v36 }
  0x48   : > { %470 = vmatmul.mubr.bf16.gmra.mrb[4].mxu0 %v239_v46  ;;  %580 = vmatmul.mubr.bf16.gmra.mrb[4].mxu1 %v261_v47  ;;  %v181_v46 = vld [vmem:[%s988_s5 + $0xe0] sm:$0xff]  ;;  %v183_v47 = vld [vmem:[%s988_s5 + $0xf0] sm:$0xff] }
  0x49   : > { %824 = vmatprep.mubr.msk.bf16.mxu0 %vm363_vm0, %v242_v48  ;;  %835 = vmatprep.mubr.msk.bf16.mxu1 %vm363_vm0, %v264_v49  ;;  %v225_v48 = vld [vmem:[%s988_s5 + $0x240] sm:$0xff]  ;;  %v227_v49 = vld [vmem:[%s988_s5 + $0x250] sm:$0xff]  ;;  %v251_v54 = vpack.c.bf16 %v183_v47, %v181_v46 }
  0x4a   : > { %v273_v55 = vpack.c.bf16 %v227_v49, %v225_v48 }
  0x50   : > { %480 = vmatmul.mubr.bf16.gmra.mrb[8].mxu0 %v241_v58  ;;  %590 = vmatmul.mubr.bf16.gmra.mrb[8].mxu1 %v263_v59  ;;  %v185_v58 = vld [vmem:[%s988_s5 + $0x100] sm:$0xff]  ;;  %v187_v59 = vld [vmem:[%s988_s5 + $0x110] sm:$0xff] }
  0x51   : > { %825 = vmatprep.mubr.msk.bf16.mxu0 %vm363_vm0, %v244_v60  ;;  %836 = vmatprep.mubr.msk.bf16.mxu1 %vm363_vm0, %v266_v61  ;;  %v229_v60 = vld [vmem:[%s988_s5 + $0x260] sm:$0xff]  ;;  %v231_v61 = vld [vmem:[%s988_s5 + $0x270] sm:$0xff]  ;;  %v253_v2 = vpack.c.bf16 %v187_v59, %v185_v58 }
  0x52   : > { %v275_v3 = vpack.c.bf16 %v231_v61, %v229_v60 }
  0x58   : > { %490 = vmatmul.mubr.bf16.gmra.mrb[12].mxu0 %v243_v6  ;;  %600 = vmatmul.mubr.bf16.gmra.mrb[12].mxu1 %v265_v7  ;;  %v189_v6 = vld [vmem:[%s988_s5 + $0x120] sm:$0xff]  ;;  %v191_v7 = vld [vmem:[%s988_s5 + $0x130] sm:$0xff] }
  0x59   : > { %826 = vmatprep.mubr.msk.bf16.mxu0 %vm363_vm0, %v246_v8  ;;  %837 = vmatprep.mubr.msk.bf16.mxu1 %vm363_vm0, %v268_v9  ;;  %v233_v8 = vld [vmem:[%s988_s5 + $0x280] sm:$0xff]  ;;  %v235_v9 = vld [vmem:[%s988_s5 + $0x290] sm:$0xff]  ;;  %v255_v12 = vpack.c.bf16 %v191_v7, %v189_v6 }
  0x5a   : > { %v277_v13 = vpack.c.bf16 %v235_v9, %v233_v8 }
  0x60   : > { %500 = vmatmul.mubr.bf16.gmra.mrb[16].mxu0 %v245_v18  ;;  %610 = vmatmul.mubr.bf16.gmra.mrb[16].mxu1 %v267_v19 }
  0x61   : > { %827 = vmatprep.mubr.msk.bf16.mxu0 %vm363_vm0, %v248_v20  ;;  %838 = vmatprep.mubr.msk.bf16.mxu1 %vm363_vm0, %v270_v21 }
  0x68   : > { %510 = vmatmul.mubr.bf16.gmra.mrb[20].mxu0 %v247_v30  ;;  %620 = vmatmul.mubr.bf16.gmra.mrb[20].mxu1 %v269_v31 }
  0x69   : > { %828 = vmatprep.mubr.msk.bf16.mxu0 %vm363_vm0, %v250_v32  ;;  %839 = vmatprep.mubr.msk.bf16.mxu1 %vm363_vm0, %v272_v33 }
  0x70   : > { %520 = vmatmul.mubr.bf16.gmra.mrb[24].mxu0 %v249_v42  ;;  %630 = vmatmul.mubr.bf16.gmra.mrb[24].mxu1 %v271_v43 }
  0x71   : > { %829 = vmatprep.mubr.msk.bf16.mxu0 %vm363_vm0, %v252_v44  ;;  %840 = vmatprep.mubr.msk.bf16.mxu1 %vm363_vm0, %v274_v45 }
  0x78   : > { %530 = vmatmul.mubr.bf16.gmra.mrb[28].mxu0 %v251_v54  ;;  %640 = vmatmul.mubr.bf16.gmra.mrb[28].mxu1 %v273_v55 }
  0x79   : > { %830 = vmatprep.mubr.msk.bf16.mxu0 %vm363_vm0, %v254_v56  ;;  %841 = vmatprep.mubr.msk.bf16.mxu1 %vm363_vm0, %v276_v57 }
  0x80   : > { %540 = vmatmul.mubr.bf16.gmra.mrb[32].mxu0 %v253_v2  ;;  %650 = vmatmul.mubr.bf16.gmra.mrb[32].mxu1 %v275_v3 }
  0x81   : > { %831 = vmatprep.mubr.msk.bf16.mxu0 %vm363_vm0, %v256_v4  ;;  %842 = vmatprep.mubr.msk.bf16.mxu1 %vm363_vm0, %v278_v5 }
  0x88   : > { %550 = vmatmul.mubr.bf16.gmra.mrb[36].mxu0 %v255_v12  ;;  %660 = vmatmul.mubr.bf16.gmra.mrb[36].mxu1 %v277_v13 }
  0x89   : > { %832 = vmatprep.mubr.msk.bf16.mxu0 %vm363_vm0, %v258_v14 }
  0x90   : > { %560 = vmatmul.mubr.bf16.gmra.mrb[40].mxu0 %v257_v17 }
 0x113   : > { %v461_v18 = vpop.f32.mrb[0].mxu0  ;;  %v571_v19 = vpop.f32.mrb[0].mxu1 }
 0x114   : > { %670 = vst [vmem:[%s1202_s3] sm:$0xff] %v461_v18  ;;  %v463_v20 = vpop.f32.mrb[1].mxu0  ;;  %715 = vst [vmem:[%s1202_s3 + $0x160] sm:$0xff] %v571_v19  ;;  %v573_v21 = vpop.f32.mrb[1].mxu1 }
 0x115   : > { %672 = vst.msk [vmem:[%s1202_s3 + $0x8] sm:$0xff] %vm671_vm1, %v463_v20  ;;  %v465_v22 = vpop.f32.mrb[2].mxu0  ;;  %716 = vst.msk [vmem:[%s1202_s3 + $0x168] sm:$0xff] %vm671_vm1, %v573_v21  ;;  %v575_v23 = vpop.f32.mrb[2].mxu1 }
 0x116   : > { %673 = vst [vmem:[%s1202_s3 + $0x10] sm:$0xff] %v465_v22  ;;  %v467_v24 = vpop.f32.mrb[3].mxu0  ;;  %717 = vst [vmem:[%s1202_s3 + $0x170] sm:$0xff] %v575_v23  ;;  %v577_v25 = vpop.f32.mrb[3].mxu1 }
 0x117   : > { %674 = vst.msk [vmem:[%s1202_s3 + $0x18] sm:$0xff] %vm671_vm1, %v467_v24  ;;  %718 = vst.msk [vmem:[%s1202_s3 + $0x178] sm:$0xff] %vm671_vm1, %v577_v25 }
 0x11b   : > { %v471_v26 = vpop.f32.mrb[4].mxu0  ;;  %v581_v27 = vpop.f32.mrb[4].mxu1 }
 0x11c   : > { %675 = vst [vmem:[%s1202_s3 + $0x20] sm:$0xff] %v471_v26  ;;  %v473_v28 = vpop.f32.mrb[5].mxu0  ;;  %719 = vst [vmem:[%s1202_s3 + $0x180] sm:$0xff] %v581_v27  ;;  %v583_v29 = vpop.f32.mrb[5].mxu1 }
 0x11d   : > { %676 = vst.msk [vmem:[%s1202_s3 + $0x28] sm:$0xff] %vm671_vm1, %v473_v28  ;;  %v475_v30 = vpop.f32.mrb[6].mxu0  ;;  %720 = vst.msk [vmem:[%s1202_s3 + $0x188] sm:$0xff] %vm671_vm1, %v583_v29  ;;  %v585_v31 = vpop.f32.mrb[6].mxu1 }
 0x11e   : > { %677 = vst [vmem:[%s1202_s3 + $0x30] sm:$0xff] %v475_v30  ;;  %v477_v32 = vpop.f32.mrb[7].mxu0  ;;  %721 = vst [vmem:[%s1202_s3 + $0x190] sm:$0xff] %v585_v31  ;;  %v587_v33 = vpop.f32.mrb[7].mxu1 }
 0x11f   : > { %678 = vst.msk [vmem:[%s1202_s3 + $0x38] sm:$0xff] %vm671_vm1, %v477_v32  ;;  %722 = vst.msk [vmem:[%s1202_s3 + $0x198] sm:$0xff] %vm671_vm1, %v587_v33 }
 0x123   : > { %v481_v34 = vpop.f32.mrb[8].mxu0  ;;  %v591_v35 = vpop.f32.mrb[8].mxu1 }
 0x124   : > { %679 = vst [vmem:[%s1202_s3 + $0x40] sm:$0xff] %v481_v34  ;;  %v483_v36 = vpop.f32.mrb[9].mxu0  ;;  %723 = vst [vmem:[%s1202_s3 + $0x1a0] sm:$0xff] %v591_v35  ;;  %v593_v37 = vpop.f32.mrb[9].mxu1 }
 0x125   : > { %680 = vst.msk [vmem:[%s1202_s3 + $0x48] sm:$0xff] %vm671_vm1, %v483_v36  ;;  %v485_v38 = vpop.f32.mrb[10].mxu0  ;;  %724 = vst.msk [vmem:[%s1202_s3 + $0x1a8] sm:$0xff] %vm671_vm1, %v593_v37  ;;  %v595_v39 = vpop.f32.mrb[10].mxu1 }
 0x126   : > { %681 = vst [vmem:[%s1202_s3 + $0x50] sm:$0xff] %v485_v38  ;;  %v487_v40 = vpop.f32.mrb[11].mxu0  ;;  %725 = vst [vmem:[%s1202_s3 + $0x1b0] sm:$0xff] %v595_v39  ;;  %v597_v41 = vpop.f32.mrb[11].mxu1 }
 0x127   : > { %682 = vst.msk [vmem:[%s1202_s3 + $0x58] sm:$0xff] %vm671_vm1, %v487_v40  ;;  %726 = vst.msk [vmem:[%s1202_s3 + $0x1b8] sm:$0xff] %vm671_vm1, %v597_v41 }
 0x12b   : > { %v491_v42 = vpop.f32.mrb[12].mxu0  ;;  %v601_v43 = vpop.f32.mrb[12].mxu1 }
 0x12c   : > { %683 = vst [vmem:[%s1202_s3 + $0x60] sm:$0xff] %v491_v42  ;;  %v493_v44 = vpop.f32.mrb[13].mxu0  ;;  %727 = vst [vmem:[%s1202_s3 + $0x1c0] sm:$0xff] %v601_v43  ;;  %v603_v45 = vpop.f32.mrb[13].mxu1 }
 0x12d   : > { %684 = vst.msk [vmem:[%s1202_s3 + $0x68] sm:$0xff] %vm671_vm1, %v493_v44  ;;  %v495_v46 = vpop.f32.mrb[14].mxu0  ;;  %728 = vst.msk [vmem:[%s1202_s3 + $0x1c8] sm:$0xff] %vm671_vm1, %v603_v45  ;;  %v605_v47 = vpop.f32.mrb[14].mxu1 }
 0x12e   : > { %685 = vst [vmem:[%s1202_s3 + $0x70] sm:$0xff] %v495_v46  ;;  %v497_v48 = vpop.f32.mrb[15].mxu0  ;;  %729 = vst [vmem:[%s1202_s3 + $0x1d0] sm:$0xff] %v605_v47  ;;  %v607_v49 = vpop.f32.mrb[15].mxu1 }
 0x12f   : > { %686 = vst.msk [vmem:[%s1202_s3 + $0x78] sm:$0xff] %vm671_vm1, %v497_v48  ;;  %730 = vst.msk [vmem:[%s1202_s3 + $0x1d8] sm:$0xff] %vm671_vm1, %v607_v49 }
 0x133   : > { %v501_v50 = vpop.f32.mrb[16].mxu0  ;;  %v611_v51 = vpop.f32.mrb[16].mxu1 }
 0x134   : > { %687 = vst [vmem:[%s1202_s3 + $0x80] sm:$0xff] %v501_v50  ;;  %v503_v52 = vpop.f32.mrb[17].mxu0  ;;  %731 = vst [vmem:[%s1202_s3 + $0x1e0] sm:$0xff] %v611_v51  ;;  %v613_v53 = vpop.f32.mrb[17].mxu1 }
 0x135   : > { %688 = vst.msk [vmem:[%s1202_s3 + $0x88] sm:$0xff] %vm671_vm1, %v503_v52  ;;  %v505_v54 = vpop.f32.mrb[18].mxu0  ;;  %732 = vst.msk [vmem:[%s1202_s3 + $0x1e8] sm:$0xff] %vm671_vm1, %v613_v53  ;;  %v615_v55 = vpop.f32.mrb[18].mxu1 }
 0x136   : > { %689 = vst [vmem:[%s1202_s3 + $0x90] sm:$0xff] %v505_v54  ;;  %v507_v56 = vpop.f32.mrb[19].mxu0  ;;  %733 = vst [vmem:[%s1202_s3 + $0x1f0] sm:$0xff] %v615_v55  ;;  %v617_v57 = vpop.f32.mrb[19].mxu1 }
 0x137   : > { %690 = vst.msk [vmem:[%s1202_s3 + $0x98] sm:$0xff] %vm671_vm1, %v507_v56  ;;  %734 = vst.msk [vmem:[%s1202_s3 + $0x1f8] sm:$0xff] %vm671_vm1, %v617_v57 }
 0x13b   : > { %v511_v58 = vpop.f32.mrb[20].mxu0  ;;  %v621_v59 = vpop.f32.mrb[20].mxu1 }
 0x13c   : > { %691 = vst [vmem:[%s1202_s3 + $0xa0] sm:$0xff] %v511_v58  ;;  %v513_v60 = vpop.f32.mrb[21].mxu0  ;;  %735 = vst [vmem:[%s1202_s3 + $0x200] sm:$0xff] %v621_v59  ;;  %v623_v61 = vpop.f32.mrb[21].mxu1 }
 0x13d   : > { %692 = vst.msk [vmem:[%s1202_s3 + $0xa8] sm:$0xff] %vm671_vm1, %v513_v60  ;;  %v515_v62 = vpop.f32.mrb[22].mxu0  ;;  %736 = vst.msk [vmem:[%s1202_s3 + $0x208] sm:$0xff] %vm671_vm1, %v623_v61  ;;  %v625_v63 = vpop.f32.mrb[22].mxu1 }
 0x13e   : > { %693 = vst [vmem:[%s1202_s3 + $0xb0] sm:$0xff] %v515_v62  ;;  %v517_v0 = vpop.f32.mrb[23].mxu0  ;;  %737 = vst [vmem:[%s1202_s3 + $0x210] sm:$0xff] %v625_v63  ;;  %v627_v1 = vpop.f32.mrb[23].mxu1 }
 0x13f   : > { %694 = vst.msk [vmem:[%s1202_s3 + $0xb8] sm:$0xff] %vm671_vm1, %v517_v0  ;;  %738 = vst.msk [vmem:[%s1202_s3 + $0x218] sm:$0xff] %vm671_vm1, %v627_v1 }
 0x143   : > { %v521_v2 = vpop.f32.mrb[24].mxu0  ;;  %v631_v3 = vpop.f32.mrb[24].mxu1 }
 0x144   : > { %695 = vst [vmem:[%s1202_s3 + $0xc0] sm:$0xff] %v521_v2  ;;  %v523_v4 = vpop.f32.mrb[25].mxu0  ;;  %739 = vst [vmem:[%s1202_s3 + $0x220] sm:$0xff] %v631_v3  ;;  %v633_v5 = vpop.f32.mrb[25].mxu1 }
 0x145   : > { %696 = vst.msk [vmem:[%s1202_s3 + $0xc8] sm:$0xff] %vm671_vm1, %v523_v4  ;;  %v525_v6 = vpop.f32.mrb[26].mxu0  ;;  %740 = vst.msk [vmem:[%s1202_s3 + $0x228] sm:$0xff] %vm671_vm1, %v633_v5  ;;  %v635_v7 = vpop.f32.mrb[26].mxu1 }
 0x146   : > { %697 = vst [vmem:[%s1202_s3 + $0xd0] sm:$0xff] %v525_v6  ;;  %v527_v8 = vpop.f32.mrb[27].mxu0  ;;  %741 = vst [vmem:[%s1202_s3 + $0x230] sm:$0xff] %v635_v7  ;;  %v637_v9 = vpop.f32.mrb[27].mxu1 }
 0x147   : > { %698 = vst.msk [vmem:[%s1202_s3 + $0xd8] sm:$0xff] %vm671_vm1, %v527_v8  ;;  %742 = vst.msk [vmem:[%s1202_s3 + $0x238] sm:$0xff] %vm671_vm1, %v637_v9 }
 0x14b   : > { %v531_v10 = vpop.f32.mrb[28].mxu0  ;;  %v641_v11 = vpop.f32.mrb[28].mxu1 }
 0x14c   : > { %699 = vst [vmem:[%s1202_s3 + $0xe0] sm:$0xff] %v531_v10  ;;  %v533_v12 = vpop.f32.mrb[29].mxu0  ;;  %743 = vst [vmem:[%s1202_s3 + $0x240] sm:$0xff] %v641_v11  ;;  %v643_v13 = vpop.f32.mrb[29].mxu1 }
 0x14d   : > { %700 = vst.msk [vmem:[%s1202_s3 + $0xe8] sm:$0xff] %vm671_vm1, %v533_v12  ;;  %v535_v14 = vpop.f32.mrb[30].mxu0  ;;  %744 = vst.msk [vmem:[%s1202_s3 + $0x248] sm:$0xff] %vm671_vm1, %v643_v13  ;;  %v645_v15 = vpop.f32.mrb[30].mxu1 }
 0x14e   : > { %701 = vst [vmem:[%s1202_s3 + $0xf0] sm:$0xff] %v535_v14  ;;  %v537_v16 = vpop.f32.mrb[31].mxu0  ;;  %745 = vst [vmem:[%s1202_s3 + $0x250] sm:$0xff] %v645_v15  ;;  %v647_v17 = vpop.f32.mrb[31].mxu1 }
 0x14f   : > { %702 = vst.msk [vmem:[%s1202_s3 + $0xf8] sm:$0xff] %vm671_vm1, %v537_v16  ;;  %746 = vst.msk [vmem:[%s1202_s3 + $0x258] sm:$0xff] %vm671_vm1, %v647_v17 }
 0x153   : > { %v541_v18 = vpop.f32.mrb[32].mxu0  ;;  %v651_v19 = vpop.f32.mrb[32].mxu1 }
 0x154   : > { %703 = vst [vmem:[%s1202_s3 + $0x100] sm:$0xff] %v541_v18  ;;  %v543_v20 = vpop.f32.mrb[33].mxu0  ;;  %747 = vst [vmem:[%s1202_s3 + $0x260] sm:$0xff] %v651_v19  ;;  %v653_v21 = vpop.f32.mrb[33].mxu1 }
 0x155   : > { %704 = vst.msk [vmem:[%s1202_s3 + $0x108] sm:$0xff] %vm671_vm1, %v543_v20  ;;  %v545_v22 = vpop.f32.mrb[34].mxu0  ;;  %748 = vst.msk [vmem:[%s1202_s3 + $0x268] sm:$0xff] %vm671_vm1, %v653_v21  ;;  %v655_v23 = vpop.f32.mrb[34].mxu1 }
 0x156   : > { %705 = vst [vmem:[%s1202_s3 + $0x110] sm:$0xff] %v545_v22  ;;  %v547_v24 = vpop.f32.mrb[35].mxu0  ;;  %749 = vst [vmem:[%s1202_s3 + $0x270] sm:$0xff] %v655_v23  ;;  %v657_v25 = vpop.f32.mrb[35].mxu1 }
 0x157   : > { %706 = vst.msk [vmem:[%s1202_s3 + $0x118] sm:$0xff] %vm671_vm1, %v547_v24  ;;  %750 = vst.msk [vmem:[%s1202_s3 + $0x278] sm:$0xff] %vm671_vm1, %v657_v25 }
 0x15b   : > { %v551_v26 = vpop.f32.mrb[36].mxu0  ;;  %v661_v27 = vpop.f32.mrb[36].mxu1 }
 0x15c   : > { %707 = vst [vmem:[%s1202_s3 + $0x120] sm:$0xff] %v551_v26  ;;  %v553_v28 = vpop.f32.mrb[37].mxu0  ;;  %751 = vst [vmem:[%s1202_s3 + $0x280] sm:$0xff] %v661_v27  ;;  %v663_v29 = vpop.f32.mrb[37].mxu1 }
 0x15d   : > { %708 = vst.msk [vmem:[%s1202_s3 + $0x128] sm:$0xff] %vm671_vm1, %v553_v28  ;;  %v555_v30 = vpop.f32.mrb[38].mxu0  ;;  %752 = vst.msk [vmem:[%s1202_s3 + $0x288] sm:$0xff] %vm671_vm1, %v663_v29  ;;  %v665_v31 = vpop.f32.mrb[38].mxu1 }
 0x15e   : > { %709 = vst [vmem:[%s1202_s3 + $0x130] sm:$0xff] %v555_v30  ;;  %v557_v32 = vpop.f32.mrb[39].mxu0  ;;  %753 = vst [vmem:[%s1202_s3 + $0x290] sm:$0xff] %v665_v31  ;;  %v667_v33 = vpop.f32.mrb[39].mxu1 }
 0x15f   : > { %710 = vst.msk [vmem:[%s1202_s3 + $0x138] sm:$0xff] %vm671_vm1, %v557_v32  ;;  %754 = vst.msk [vmem:[%s1202_s3 + $0x298] sm:$0xff] %vm671_vm1, %v667_v33 }
 0x163   : > { %v561_v34 = vpop.f32.mrb[40].mxu0 }
 0x164   : > { %711 = vst [vmem:[%s1202_s3 + $0x140] sm:$0xff] %v561_v34  ;;  %v563_v35 = vpop.f32.mrb[41].mxu0 }
 0x165   : > { %712 = vst.msk [vmem:[%s1202_s3 + $0x148] sm:$0xff] %vm671_vm1, %v563_v35  ;;  %v565_v36 = vpop.f32.mrb[42].mxu0 }
 0x166   : > { %713 = vst [vmem:[%s1202_s3 + $0x150] sm:$0xff] %v565_v36  ;;  %v567_v37 = vpop.f32.mrb[43].mxu0 }
 0x167   : > { %714 = vst.msk [vmem:[%s1202_s3 + $0x158] sm:$0xff] %vm671_vm1, %v567_v37 }
 0x168 PF: > { %s12_s9 = sadd.s32 1, %s889_s9  }
 0x169   : > { %p9_p4 = scmp.ge.s32.totalorder %s12_s9, 6  }
 0x16b   :  { %11 = sbr.rel (!%p9_p4) target bundleno = 1 (0x1), region = 58 }

</bundles_post_ra>
